<compile_context>
chip_gen: v7x
topology: tpu7x:2x2x1
jax: 0.10.0
libtpu: 0.0.40
codegen_flags: <defaults>
</compile_context>

<pallas_src>
import jax
import jax.numpy as jnp
from jax.experimental import pallas as pl
from jax.experimental.pallas import tpu as pltpu

_LANE = 128            # TPU lane width — keep the last dim exactly lane-dense.
_MAX_BLOCK_ROWS = 4096  # (4096, 128) f32 tile = 2 MiB/buffer; ~85% HBM roofline.
_TARGET_STEPS = 8       # aim for >= 8 grid steps (4 per TC on v7x megacore).


def _round_up(v, m):
    return ((v + m - 1) // m) * m


def _sublane_granule(dtype):
    # 8 sublanes of 32-bit; sub-32-bit dtypes pack along sublanes.
    itemsize = jnp.dtype(dtype).itemsize
    return max(8, 32 // itemsize)   # 8 (f32), 16 (bf16/f16), 32 (int8/fp8)


def _telu_kernel(x_ref, o_ref):
    # Upcast in-register; exp/tanh go to the EUP slot, the mul is the only
    # VALU op, so compute is far off the critical (HBM) path.
    x = x_ref[...].astype(jnp.float32)
    o_ref[...] = (x * jnp.tanh(jnp.exp(x))).astype(o_ref.dtype)


def telu(x, *, in_place=False):
    """Elementwise TeLU (x * tanh(exp(x))) via a tiled, lane-dense Pallas kernel.

    Set in_place=True only when the input buffer is donated at the jit
    boundary; otherwise XLA would add a defensive copy of the input.
    """
    orig_shape = x.shape
    dtype = x.dtype
    n = x.size
    if n == 0:
        return x

    xf = x.reshape(-1)

    # Pad only a ragged tail (< 128 elements) so the flat array is (rows, 128).
    rem = n % _LANE
    if rem:
        xf = jnp.pad(xf, (0, _LANE - rem))   # telu(0) == 0; sliced off below
    rows = xf.shape[0] // _LANE
    x2 = xf.reshape(rows, _LANE)

    granule = _sublane_granule(dtype)
    # Size the tile so we get ~_TARGET_STEPS grid steps (megacore + pipelining)
    # but never exceed _MAX_BLOCK_ROWS; always a multiple of the sublane granule.
    block_rows = _round_up(pl.cdiv(rows, _TARGET_STEPS), granule)
    block_rows = max(granule, min(_MAX_BLOCK_ROWS, block_rows))

    grid = (pl.cdiv(rows, block_rows),)   # ragged last block is masked by Pallas
    itemsize = jnp.dtype(dtype).itemsize

    extra = {}
    if in_place:
        extra["input_output_aliases"] = {0: 0}

    out = pl.pallas_call(
        _telu_kernel,
        out_shape=jax.ShapeDtypeStruct((rows, _LANE), dtype),
        grid=grid,
        in_specs=[pl.BlockSpec((block_rows, _LANE), lambda i: (i, 0))],
        out_specs=pl.BlockSpec((block_rows, _LANE), lambda i: (i, 0)),
        compiler_params=pltpu.CompilerParams(
            dimension_semantics=("parallel",),   # megacore sharding on v7x
        ),
        cost_estimate=pl.CostEstimate(
            flops=n,                       # one multiply per element
            transcendentals=2 * n,         # exp + tanh per element
            bytes_accessed=2 * n * itemsize,
        ),
        **extra,
    )(x2)

    out = out.reshape(-1)
    if rem:
        out = out[:n]
    return out.reshape(orig_shape)


def _ref_telu(x):
    xf = x.astype(jnp.float32)
    return (xf * jnp.tanh(jnp.exp(xf))).astype(x.dtype)


if __name__ == "__main__":
    key = jax.random.PRNGKey(0)
    k1, k2, k3, k4 = jax.random.split(key, 4)
    telu_jit = jax.jit(telu)

    # Small shape consistent with the module (elementwise activation on NCHW input).
    x_small = jax.random.normal(k1, (2, 4, 16, 16), jnp.float32)
    y_small = jax.block_until_ready(telu_jit(x_small))
    assert y_small.shape == x_small.shape and y_small.dtype == x_small.dtype
    assert bool(jnp.all(jnp.isfinite(y_small)))
    assert bool(jnp.allclose(y_small, _ref_telu(x_small), rtol=1e-6, atol=1e-6))

    # Larger shape to exercise the multi-step grid / pipelined path.
    x_big = jax.random.normal(k2, (8, 32, 32, 32), jnp.float32)
    y_big = jax.block_until_ready(telu_jit(x_big))
    assert y_big.shape == x_big.shape
    assert bool(jnp.all(jnp.isfinite(y_big)))
    assert bool(jnp.allclose(y_big, _ref_telu(x_big), rtol=1e-6, atol=1e-6))

    # bf16 input: exercises the native-dtype DMA path (16-row sublane granule).
    x_bf16 = jax.random.normal(k3, (4, 8, 16, 16), jnp.bfloat16)
    y_bf16 = jax.block_until_ready(telu_jit(x_bf16))
    assert y_bf16.dtype == jnp.bfloat16 and y_bf16.shape == x_bf16.shape
    assert bool(jnp.allclose(y_bf16.astype(jnp.float32),
                             _ref_telu(x_bf16).astype(jnp.float32),
                             rtol=1e-2, atol=1e-2))

    # Ragged size (not a multiple of 128): exercises tail pad + masked block.
    x_rag = jax.random.normal(k4, (3, 5, 7), jnp.float32)
    y_rag = jax.block_until_ready(telu_jit(x_rag))
    assert y_rag.shape == x_rag.shape
    assert bool(jnp.allclose(y_rag, _ref_telu(x_rag), rtol=1e-6, atol=1e-6))

    print("KERNEL_OK")
</pallas_src>

<mosaic_0001>
module attributes {stable_mosaic.version = 11 : i64} {
  func.func @_telu_kernel(%arg0: i32, %arg1: memref<8x128xf32, #tpu.memory_space<vmem>>, %arg2: memref<8x128xf32, #tpu.memory_space<vmem>>) attributes {dimension_semantics = [#tpu.dimension_semantics<parallel>], iteration_bounds = array<i64: 2>, scalar_prefetch = 0 : i64, scratch_operands = 0 : i64, tpu.core_type = #tpu.core_type<tc>, window_params = [{transform_indices = @transform_0, window_bounds = array<i64: 8, 128>}, {transform_indices = @transform_1, window_bounds = array<i64: 8, 128>}]} {
    %c0 = arith.constant 0 : index
    %c0_0 = arith.constant 0 : index
    %0 = vector.load %arg1[%c0, %c0_0] : memref<8x128xf32, #tpu.memory_space<vmem>>, vector<8x128xf32>
    %1 = math.exp %0 : vector<8x128xf32>
    %2 = math.tanh %1 : vector<8x128xf32>
    %3 = arith.mulf %0, %2 : vector<8x128xf32>
    %c0_1 = arith.constant 0 : index
    %c0_2 = arith.constant 0 : index
    %4 = vector.load %arg2[%c0_1, %c0_2] : memref<8x128xf32, #tpu.memory_space<vmem>>, vector<8x128xf32>
    tpu.vector_store %arg2[%c0_1, %c0_2], %3 {strides = array<i32>} : memref<8x128xf32, #tpu.memory_space<vmem>>, vector<8x128xf32>,
    return
  }
  func.func @transform_0(%arg0: i32) -> (i32, i32) {
    %c0_i32 = arith.constant 0 : i32
    %c0_i32_0 = arith.constant 0 : i32
    return %arg0, %c0_i32 : i32, i32
  }
  func.func @transform_1(%arg0: i32) -> (i32, i32) {
    %c0_i32 = arith.constant 0 : i32
    %c0_i32_0 = arith.constant 0 : i32
    return %arg0, %c0_i32 : i32, i32
  }
}

</mosaic_0001>

<bundles_post_ra>
// kernel: telu.1
= control target key start
LH: loop header
LB: loop body
LE: loop exit
PB: predicated region body
PF: predicated region fallthrough
CT: control target
= control target key end

     0   :  { %s196_s6 = smov 0   ;;  %s216_s0 = inlined_call_operand.vmem [shape: f32[16,128], index: 0, kind: input, shape index: {}]   ;;  %s217_s1 = inlined_call_operand.vmem [shape: f32[16,128], index: 1, kind: output, shape index: {}]  }
   0x1 LB: > { %s171_s7 = sadd.s32 4294967295, %s198_s6   ;;  %p175_p0 = scmp.ge.s32.totalorder %s198_s6, 1  ;;  %s198_s6 = sphi %s196_s6, %s11_s6  }
   0x2   : > { %p86_p1 = scmp.lt.s32.totalorder %s198_s6, 3 }
   0x4   : > { %p87_p2 = pnand %p175_p0, %p86_p1 }
   0x5   : > { %p104_p3 = scmp.lt.s32.totalorder (!%p87_p2), %s171_s7, 1 }
   0x6   : > { %90 = sbr.rel (%p87_p2) target bundleno = 44 (0x2c), region = 24 }
   0xd   : > { %s219_s7 = smov (!%p104_p3, %s171_s7), 1 }
   0xe   : > { %s176_s8 = sshll.u32 %s219_s7, 3 }
   0xf   : > { %s107_s11 = scalar_lea.vmem %s216_s0, %s176_s8  ;;  %s111_s14 = scalar_lea.vmem %s217_s1, %s176_s8 }
  0x10   : > { %v112_v0 = vld [vmem:[%s107_s11] sm:$0xff] }
  0x11   : > { %v113_v1 = vmul.f32 1.442695, %v112_v0 }
  0x13   : > { %188 = vpow2.f32 %v113_v1 }
  0x1d   : > { %v189_v2 = vpop.eup %188 }
  0x1e   : > { %190 = vtanh.f32 %v189_v2 }
  0x28   : > { %v191_v3 = vpop.eup %190 }
  0x29   : > { %v116_v4 = vmul.f32 %v191_v3, %v112_v0 }
  0x2b   : > { %117 = vst [vmem:[%s111_s14] sm:$0xff] %v116_v4 }
  0x2c PF: > { %s11_s6 = sadd.s32 1, %s198_s6  }
  0x2d   : > { %p8_p4 = scmp.ge.s32.totalorder %s11_s6, 4  }
  0x2f   :  { %10 = sbr.rel (!%p8_p4) target bundleno = 1 (0x1), region = 54 }

</bundles_post_ra>
